<compile_context>
chip_gen: v6e
topology: v6e:2x2x1
jax: 0.10.0
libtpu: 0.0.40
codegen_flags: <defaults>
</compile_context>

<pallas_src>
import functools

import jax
import jax.numpy as jnp
from jax import lax
from jax.experimental import pallas as pl
from jax.experimental.pallas import tpu as pltpu

LANE = 128                      # lane width (last dim of every block)
MAX_TM = 4096                   # rows per grid step: 4096*128*4B = 2 MiB / f32 input
EPS = 1e-07
_VMEM_LIMIT = 32 * 1024 * 1024  # 2 inputs x 2 buffers x 2 MiB + scratch, with headroom


def _round_up(x, m):
    return ((x + m - 1) // m) * m


def _num_tensorcores():
    # Only v7x exposes 2 TensorCores per chip worth sharding the reduction
    # over; v5e/v6e (single TC) get a size-1 core axis so there is no wasted
    # duplicated/masked step, no doubled partials buffer.
    try:
        kind = jax.devices()[0].device_kind.lower()
    except Exception:
        return 1
    return 2 if ("v7" in kind or "tpu7" in kind) else 1


NCORES = _num_tensorcores()


def _wbce_kernel(pred_ref, lab_ref, out_ref, *, tm, bpc, nblocks, rows,
                 w_p, w_n, overhang, edge_masked):
    """Accumulates w_p*y*log(p+eps) + w_n*(1-y)*log(1-p+eps), reduced to an
    (8, 128) resident block per core."""
    c = pl.program_id(0)
    i = pl.program_id(1)

    @pl.when(i == 0)
    def _():
        out_ref[...] = jnp.zeros_like(out_ref)

    blk = c * bpc + i                      # global block index along row axis

    def contrib_sum(masked):
        p = pred_ref[...].astype(jnp.float32)
        y = lab_ref[...].astype(jnp.float32)
        # TODO(synk): if labels were guaranteed {0,1}, a single log via
        # jnp.where(y > 0.5, p, 1-p) would halve EUP pushes (matters on v7x,
        # which is compute-slot bound); the PyTorch module allows soft labels,
        # so we keep the exact two-log form.
        contrib = (w_p * y) * jnp.log(p + EPS) \
            + (w_n * (1.0 - y)) * jnp.log(1.0 - p + EPS)
        if masked:
            # Row-level validity: blk*tm + row stays far below 2**31 for any
            # realistic N, avoiding the int32-overflow hazard of flat offsets.
            row = lax.broadcasted_iota(jnp.int32, (tm, LANE), 0)
            valid = (blk * tm + row) < rows
            # Keep jnp.where (select): out-of-range rows of the edge block are
            # stale VMEM whose log() may be NaN; select does not propagate it.
            # Do NOT rewrite as a multiply-by-0/1 mask.
            contrib = jnp.where(valid, contrib, 0.0)
        # Reduce (tm,128) -> (8,128) with pure VALU adds so the resident
        # accumulator is a single (8,128) tile: frees vld/vst bundle slots and
        # shrinks the HBM writeback plus the final XLA sum.
        # TODO(synk): if a v7x bundle dump still shows VALU binding, this
        # reduction could move to the idle MXU via jnp.dot(ones((8, tm)), c).
        return contrib.reshape(tm // 8, 8, LANE).sum(axis=0)

    if not overhang and not edge_masked:
        # Fast path: every grid step covers exactly tm valid rows.
        out_ref[...] += contrib_sum(False)
    else:
        interior_hi = (nblocks - 1) if edge_masked else nblocks

        @pl.when(blk < interior_hi)
        def _():
            out_ref[...] += contrib_sum(False)       # interior: no mask math

        if edge_masked:
            @pl.when(blk == nblocks - 1)
            def _():
                out_ref[...] += contrib_sum(True)    # only the edge block pays
        # blk >= nblocks (per-core overhang): the clamped index_map re-reads
        # the last real block, but nothing is accumulated.


@functools.partial(jax.jit, static_argnames=("w_p", "w_n"))
def w_bce_with_logits_loss(pred, labels, w_p, w_n):
    """Weighted BCE loss. pred/labels: any shape (e.g. NCHW); w_p/w_n static scalars."""
    w_p = float(w_p)
    w_n = float(w_n)
    n = pred.size                       # static under jit
    flat_p = pred.reshape(-1)           # keep native dtype; upcast in-kernel
    flat_y = labels.reshape(-1)

    rows = n // LANE                    # full lane-rows handled by the kernel
    n_main = rows * LANE                # <=127-element tail handled by XLA

    total = jnp.zeros((), jnp.float32)
    if rows > 0:
        # No jnp.pad of the full inputs: kernel runs on a prefix view.
        p2 = flat_p[:n_main].reshape(rows, LANE)
        y2 = flat_y[:n_main].reshape(rows, LANE)

        tm = int(min(MAX_TM, _round_up(rows, 8)))   # block rows, multiple of 8
        nblocks = int(pl.cdiv(rows, tm))
        ncores = NCORES if nblocks >= NCORES else 1
        bpc = int(pl.cdiv(nblocks, ncores))          # grid steps per core
        overhang = (ncores * bpc) != nblocks         # clamped duplicate steps?
        edge_masked = (rows % tm) != 0               # partial last block?

        kernel = functools.partial(
            _wbce_kernel, tm=tm, bpc=bpc, nblocks=nblocks, rows=rows,
            w_p=w_p, w_n=w_n, overhang=overhang, edge_masked=edge_masked)

        def in_map(c, i):
            # Overhanging steps re-read the last real block; their contribution
            # is skipped in-kernel.
            return (jnp.minimum(c * bpc + i, nblocks - 1), 0)

        partials = pl.pallas_call(
            kernel,
            out_shape=jax.ShapeDtypeStruct((ncores * 8, LANE), jnp.float32),
            grid_spec=pltpu.PrefetchScalarGridSpec(
                num_scalar_prefetch=0,
                grid=(ncores, bpc),
                in_specs=[
                    pl.BlockSpec((tm, LANE), in_map),   # pred
                    pl.BlockSpec((tm, LANE), in_map),   # labels
                ],
                # One resident (8,128) accumulator block per core.
                out_specs=pl.BlockSpec((8, LANE), lambda c, i: (c, 0)),
            ),
            # TODO(synk): on v7x, verify via trace that the core axis really
            # shards across both TensorCores; if not, switch axis 0 to
            # pltpu.CORE_PARALLEL / pl.core_map.
            compiler_params=pltpu.CompilerParams(
                dimension_semantics=("parallel", "arbitrary"),
                vmem_limit_bytes=_VMEM_LIMIT),
        )(p2, y2)
        total = jnp.sum(partials)

    if n_main < n:
        # <=127-element lane tail: computed directly by XLA (avoids copying /
        # padding the whole input for a handful of elements).
        tp = flat_p[n_main:].astype(jnp.float32)
        ty = flat_y[n_main:].astype(jnp.float32)
        total = total + jnp.sum(
            (w_p * ty) * jnp.log(tp + EPS)
            + (w_n * (1.0 - ty)) * jnp.log(1.0 - tp + EPS))

    # Both means in the reference divide by the same element count N, so:
    #   loss = -sum(weighted log terms) / N.
    return (-total / n).astype(jnp.float32)


def _reference(pred, labels, w_p, w_n, eps=EPS):
    pred = pred.astype(jnp.float32)
    labels = labels.astype(jnp.float32)
    loss_pos = -1.0 * jnp.mean(w_p * labels * jnp.log(pred + eps))
    loss_neg = -1.0 * jnp.mean(w_n * (1.0 - labels) * jnp.log(1.0 - pred + eps))
    return loss_pos + loss_neg


if __name__ == "__main__":
    key = jax.random.PRNGKey(0)
    k1, k2, k3, k4 = jax.random.split(key, 4)

    w_p, w_n = 2.0, 1.0   # class weights, fixed at module construction (static)

    # Main check: NCHW input like the PyTorch module's forward.
    B, C, H, W = 2, 4, 16, 16
    pred = jax.nn.sigmoid(jax.random.normal(k1, (B, C, H, W), jnp.float32))
    labels = (jax.random.uniform(k2, (B, C, H, W)) > 0.5).astype(jnp.float32)
    out = jax.block_until_ready(
        w_bce_with_logits_loss(pred, labels, w_p=w_p, w_n=w_n))
    ref = _reference(pred, labels, w_p, w_n)
    assert jnp.allclose(out, ref, rtol=1e-5, atol=1e-6), (out, ref)

    # Misaligned check: 3*5*7*11 = 1155 elements -> 9 full lane-rows handled by
    # the kernel's masked edge block + a 3-element tail handled by XLA.
    shape2 = (3, 5, 7, 11)
    pred2 = jax.nn.sigmoid(jax.random.normal(k3, shape2, jnp.float32))
    labels2 = (jax.random.uniform(k4, shape2) > 0.5).astype(jnp.float32)
    out2 = jax.block_until_ready(
        w_bce_with_logits_loss(pred2, labels2, w_p=w_p, w_n=w_n))
    ref2 = _reference(pred2, labels2, w_p, w_n)
    assert jnp.allclose(out2, ref2, rtol=1e-5, atol=1e-6), (out2, ref2)

    print("KERNEL_OK")
</pallas_src>

<mosaic_0001>
module attributes {stable_mosaic.version = 11 : i64} {
  func.func @_wbce_kernel(%arg0: i32, %arg1: i32, %arg2: memref<16x128xf32, #tpu.memory_space<vmem>>, %arg3: memref<16x128xf32, #tpu.memory_space<vmem>>, %arg4: memref<8x128xf32, #tpu.memory_space<vmem>>) attributes {dimension_semantics = [#tpu.dimension_semantics<parallel>, #tpu.dimension_semantics<arbitrary>], iteration_bounds = array<i64: 1, 1>, scalar_prefetch = 0 : i64, scratch_operands = 0 : i64, tpu.core_type = #tpu.core_type<tc>, window_params = [{transform_indices = @transform_0, window_bounds = array<i64: 16, 128>}, {transform_indices = @transform_1, window_bounds = array<i64: 16, 128>}, {transform_indices = @transform_2, window_bounds = array<i64: 8, 128>}]} {
    %c0_i32 = arith.constant 0 : i32
    %0 = arith.cmpi eq, %arg1, %c0_i32 : i32
    %1 = arith.extui %0 : i1 to i32
    %c0_i32_0 = arith.constant 0 : i32
    %2 = arith.cmpi ne, %1, %c0_i32_0 : i32
    scf.if %2 {
      %cst_14 = arith.constant 0.000000e+00 : f32
      %27 = vector.broadcast %cst_14 : f32 to vector<8x128xf32>
      %c0_15 = arith.constant 0 : index
      %c0_16 = arith.constant 0 : index
      %28 = vector.load %arg4[%c0_15, %c0_16] : memref<8x128xf32, #tpu.memory_space<vmem>>, vector<8x128xf32>
      tpu.vector_store %arg4[%c0_15, %c0_16], %27 {strides = array<i32>} : memref<8x128xf32, #tpu.memory_space<vmem>>, vector<8x128xf32>,
    } else {
    }
    %c0 = arith.constant 0 : index
    %c0_1 = arith.constant 0 : index
    %3 = vector.load %arg4[%c0, %c0_1] : memref<8x128xf32, #tpu.memory_space<vmem>>, vector<8x128xf32>
    %c0_2 = arith.constant 0 : index
    %c0_3 = arith.constant 0 : index
    %4 = vector.load %arg2[%c0_2, %c0_3] : memref<16x128xf32, #tpu.memory_space<vmem>>, vector<16x128xf32>
    %c0_4 = arith.constant 0 : index
    %c0_5 = arith.constant 0 : index
    %5 = vector.load %arg3[%c0_4, %c0_5] : memref<16x128xf32, #tpu.memory_space<vmem>>, vector<16x128xf32>
    %cst = arith.constant 2.000000e+00 : f32
    %6 = vector.broadcast %cst : f32 to vector<16x128xf32>
    %7 = arith.mulf %6, %5 : vector<16x128xf32>
    %cst_6 = arith.constant 1.000000e-07 : f32
    %8 = vector.broadcast %cst_6 : f32 to vector<16x128xf32>
    %9 = arith.addf %4, %8 : vector<16x128xf32>
    %10 = math.log %9 : vector<16x128xf32>
    %11 = arith.mulf %7, %10 : vector<16x128xf32>
    %cst_7 = arith.constant 1.000000e+00 : f32
    %12 = vector.broadcast %cst_7 : f32 to vector<16x128xf32>
    %13 = arith.subf %12, %5 : vector<16x128xf32>
    %cst_8 = arith.constant 1.000000e+00 : f32
    %14 = vector.broadcast %cst_8 : f32 to vector<16x128xf32>
    %15 = arith.mulf %14, %13 : vector<16x128xf32>
    %cst_9 = arith.constant 1.000000e+00 : f32
    %16 = vector.broadcast %cst_9 : f32 to vector<16x128xf32>
    %17 = arith.subf %16, %4 : vector<16x128xf32>
    %cst_10 = arith.constant 1.000000e-07 : f32
    %18 = vector.broadcast %cst_10 : f32 to vector<16x128xf32>
    %19 = arith.addf %17, %18 : vector<16x128xf32>
    %20 = math.log %19 : vector<16x128xf32>
    %21 = arith.mulf %15, %20 : vector<16x128xf32>
    %22 = arith.addf %11, %21 : vector<16x128xf32>
    %23 = vector.shape_cast %22 : vector<16x128xf32> to vector<2x8x128xf32>
    %cst_11 = arith.constant dense<0.000000e+00> : vector<8x128xf32>
    %24 = vector.multi_reduction <add>, %23, %cst_11 [0] : vector<2x8x128xf32> to vector<8x128xf32>
    %25 = arith.addf %3, %24 : vector<8x128xf32>
    %c0_12 = arith.constant 0 : index
    %c0_13 = arith.constant 0 : index
    %26 = vector.load %arg4[%c0_12, %c0_13] : memref<8x128xf32, #tpu.memory_space<vmem>>, vector<8x128xf32>
    tpu.vector_store %arg4[%c0_12, %c0_13], %25 {strides = array<i32>} : memref<8x128xf32, #tpu.memory_space<vmem>>, vector<8x128xf32>,
    return
  }
  func.func @transform_0(%arg0: i32, %arg1: i32) -> (i32, i32) {
    %c1_i32 = arith.constant 1 : i32
    %0 = arith.muli %arg0, %c1_i32 : i32
    %1 = arith.addi %0, %arg1 : i32
    %c0_i32 = arith.constant 0 : i32
    %2 = arith.minsi %1, %c0_i32 : i32
    %c0_i32_0 = arith.constant 0 : i32
    %c0_i32_1 = arith.constant 0 : i32
    return %2, %c0_i32_0 : i32, i32
  }
  func.func @transform_1(%arg0: i32, %arg1: i32) -> (i32, i32) {
    %c1_i32 = arith.constant 1 : i32
    %0 = arith.muli %arg0, %c1_i32 : i32
    %1 = arith.addi %0, %arg1 : i32
    %c0_i32 = arith.constant 0 : i32
    %2 = arith.minsi %1, %c0_i32 : i32
    %c0_i32_0 = arith.constant 0 : i32
    %c0_i32_1 = arith.constant 0 : i32
    return %2, %c0_i32_0 : i32, i32
  }
  func.func @transform_2(%arg0: i32, %arg1: i32) -> (i32, i32) {
    %c0_i32 = arith.constant 0 : i32
    %c0_i32_0 = arith.constant 0 : i32
    return %arg0, %c0_i32 : i32, i32
  }
}

</mosaic_0001>

<bundles_post_ra>
// kernel: w_bce_with_logits_loss.1
= control target key start
LH: loop header
LB: loop body
LE: loop exit
PB: predicated region body
PF: predicated region fallthrough
CT: control target
= control target key end

     0   :  { %s167_s0 = inlined_call_operand.vmem [shape: f32[16,128], index: 0, kind: input, shape index: {}]   ;;  %s168_s1 = inlined_call_operand.vmem [shape: f32[16,128], index: 1, kind: input, shape index: {}]   ;;  %s169_s2 = inlined_call_operand.vmem [shape: f32[8,128], index: 2, kind: output, shape index: {}]  }
   0x1   :  { %v81_v0 = vld [vmem:[%s167_s0] sm:$0xff]  ;;  %v82_v1 = vld [vmem:[%s167_s0 + $0x8] sm:$0xff] }
   0x2   :  { %v87_v2 = vadd.f32 1e-07, %v81_v0  ;;  %v88_v3 = vadd.f32 1e-07, %v82_v1  ;;  %v97_v4 = vsub.f32 1.0, %v81_v0  ;;  %v98_v5 = vsub.f32 1.0, %v82_v1 }
   0x3   :  { %v83_v8 = vld [vmem:[%s168_s1] sm:$0xff]  ;;  %v84_v9 = vld [vmem:[%s168_s1 + $0x8] sm:$0xff] }
   0x4   :  { %129 = vlog2.f32 %v87_v2  ;;  %v99_v6 = vadd.f32 1e-07, %v97_v4  ;;  %v100_v7 = vadd.f32 1e-07, %v98_v5  ;;  %v85_v11 = vmul.f32 2.0, %v83_v8 }
   0x5   :  { %131 = vlog2.f32 %v88_v3  ;;  %v86_v13 = vmul.f32 2.0, %v84_v9  ;;  %v95_v16 = vsub.f32 1.0, %v83_v8  ;;  %v96_v18 = vsub.f32 1.0, %v84_v9 }
   0x6   :  { %133 = vlog2.f32 %v99_v6 }
   0x7   :  { %135 = vlog2.f32 %v100_v7 }
  0x11   :  { %v130_v10 = vpop.eup %129 }
  0x12   :  { %v132_v12 = vpop.eup %131  ;;  %v90_v14 = vmul.f32 0.6931472, %v130_v10 }
  0x13   :  { %v92_v15 = vmul.f32 0.6931472, %v132_v12  ;;  %v134_v17 = vpop.eup %133 }
  0x14   :  { %v136_v19 = vpop.eup %135  ;;  %v93_v20 = vmul.f32 %v90_v14, %v85_v11  ;;  %v102_v21 = vmul.f32 0.6931472, %v134_v17 }
  0x15   :  { %v94_v22 = vmul.f32 %v92_v15, %v86_v13  ;;  %v104_v23 = vmul.f32 0.6931472, %v136_v19 }
  0x16   :  { %v105_v24 = vmul.f32 %v102_v21, %v95_v16 }
  0x17   :  { %v106_v25 = vmul.f32 %v104_v23, %v96_v18 }
  0x18   :  { %v107_v26 = vadd.f32 %v105_v24, %v93_v20 }
  0x19   :  { %v108_v27 = vadd.f32 %v106_v25, %v94_v22 }
  0x1b   :  { %v109_v28 = vadd.f32 %v108_v27, %v107_v26 }
  0x1d   :  { %111 = vst [vmem:[%s169_s2] sm:$0xff] %v109_v28 }

</bundles_post_ra>
